<compile_context>
chip_gen: v5e
topology: v5e:2x2
jax: 0.10.0
libtpu: 0.0.40
codegen_flags: <defaults>
</compile_context>

<pallas_src>
from collections import OrderedDict

import numpy as np
import jax
import jax.numpy as jnp
from jax.experimental import pallas as pl
from jax.experimental.pallas import tpu as pltpu

KSIZE = 21
PAD = KSIZE // 2
RANGE_X = (0.2, 3.0)
RANGE_RADIUS = (3, 11)


# ----------------------------------------------------------------------------
# Hot-path Pallas kernel: fused reflect-pad + separable blur + quantization.
# One grid step per batch element; ALL channels folded into two MXU matmuls
# (C into M for the horizontal pass, C into N for the vertical pass).
# ----------------------------------------------------------------------------
def _make_blur_quant_body(C, H, W, operand_dtype):
    def body(x_ref, mh_ref, awT_ref, o_ref, t_sc):
        mh = mh_ref[0]                          # (H, H)  vertical band operator
        awT = awT_ref[0]                        # (W, W)  horizontal band operator
        x = x_ref[0]                            # (C*H, W) image, C folded into rows

        # Horizontal pass: ONE (C*H, W) @ (W, W) MXU matmul (reflect padding is
        # folded into the banded operator, so no padded image exists anywhere).
        t = jnp.dot(x.astype(operand_dtype), awT,
                    preferred_element_type=jnp.float32)            # (C*H, W) f32

        # Relayout (C, H, W) -> (H, C*W) with C static slice copies through VMEM
        # scratch (vector ld/st, overlaps the MXU) so the vertical pass is ONE
        # matmul with C folded into the N dimension.
        for c in range(C):
            t_sc[:, c * W:(c + 1) * W] = t[c * H:(c + 1) * H, :]

        # Vertical pass: ONE (H, H) @ (H, C*W) MXU matmul.
        y = jnp.dot(mh, t_sc[...].astype(operand_dtype),
                    preferred_element_type=jnp.float32)            # (H, C*W) f32

        # Fused Degrader epilogue: clamp(x*255, 0, 255).round() * (1/255).
        o_ref[0] = jnp.round(jnp.clip(y * 255.0, 0.0, 255.0)) * (1.0 / 255.0)

    return body


def _vmem_limit_bytes(C, H, W, operand_dtype):
    esize = np.dtype(operand_dtype).itemsize
    # double-buffered image-in / image-out blocks + operators, plus scratch.
    blocks = 2 * (C * H * W * 4 + H * C * W * 4 + H * H * esize + W * W * esize)
    blocks += H * C * W * 4
    want = max(32 << 20, blocks + (4 << 20))
    try:
        cap = int(pltpu.get_tpu_info().vmem_capacity_bytes)   # 64 MiB/TC on v7x
    except Exception:
        cap = 64 << 20
    return int(min(want, int(cap * 0.9)))


def blur_quantize(x, m_h, a_wT, operand_dtype=jnp.float32):
    """x: (B, C, H, W) f32; m_h: (B, H, H); a_wT: (B, W, W).

    Returns the blurred + quantized image laid out lane-dense as (B, H, C*W).
    """
    B, C, H, W = x.shape
    x_rows = x.astype(jnp.float32).reshape(B, C * H, W)   # contiguous, free reshape
    out = pl.pallas_call(
        _make_blur_quant_body(C, H, W, operand_dtype),
        out_shape=jax.ShapeDtypeStruct((B, H, C * W), jnp.float32),
        grid=(B,),
        in_specs=[
            pl.BlockSpec((1, C * H, W), lambda b: (b, 0, 0)),   # image rows
            pl.BlockSpec((1, H, H), lambda b: (b, 0, 0)),       # vertical operator
            pl.BlockSpec((1, W, W), lambda b: (b, 0, 0)),       # horizontal operator
        ],
        out_specs=pl.BlockSpec((1, H, C * W), lambda b: (b, 0, 0)),
        scratch_shapes=[pltpu.VMEM((H, C * W), jnp.float32)],
        compiler_params=pltpu.CompilerParams(
            dimension_semantics=("parallel",),
            vmem_limit_bytes=_vmem_limit_bytes(C, H, W, operand_dtype)),
    )(x_rows, m_h.astype(operand_dtype), a_wT.astype(operand_dtype))
    # TODO(synk): add a band-sliced W-tile grid axis (halo=PAD) marked "parallel"
    # for large images / v7x two-TC utilization when B == 1.
    return out


# ----------------------------------------------------------------------------
# Tiny per-batch setup in plain XLA (review: one Pallas dispatch, no (n,K,n)
# one-hot, no extra HBM round trips of KB-scale intermediates).
# ----------------------------------------------------------------------------
def _make_blur_kernels(sigma, radius_f, xx, yy):
    """Per-batch iso-Gaussian x box-mask blur kernels (B, K, K), normalized."""
    sig = sigma[:, None, None]
    rad = radius_f[:, None, None]
    dist = (xx * xx + yy * yy)[None] / (2.0 * sig * sig)
    k = jnp.exp(-dist)
    mask = jnp.logical_and(jnp.abs(xx)[None] - rad <= 0.0,
                           jnp.abs(yy)[None] - rad <= 0.0)
    k = jnp.where(mask, k, 0.0)
    return k / jnp.sum(k, axis=(1, 2), keepdims=True)


def _reflect_band(k1d, n):
    """Banded (B, n, n) operator with PyTorch 'reflect' padding folded in:
    (M @ img)[i] = sum_v k1d[v] * img[reflect(i + v - PAD)].
    Built with an O(n*K) scatter-add (no one-hot materialization)."""
    i = jnp.arange(n, dtype=jnp.int32)[:, None]            # (n, 1)
    v = jnp.arange(KSIZE, dtype=jnp.int32)[None, :]        # (1, K)
    t = i + v - PAD                                        # (n, K)
    src = jnp.where(t < 0, -t, jnp.where(t >= n, 2 * (n - 1) - t, t))
    rows = jnp.broadcast_to(i, (n, KSIZE)).reshape(-1)     # (n*K,)
    cols = src.reshape(-1)                                 # (n*K,)
    B = k1d.shape[0]
    vals = jnp.broadcast_to(k1d[:, None, :], (B, n, KSIZE)).reshape(B, -1)
    band = jnp.zeros((B, n, n), jnp.float32)
    return band.at[:, rows, cols].add(vals.astype(jnp.float32))


# ----------------------------------------------------------------------------
# Degrader wrapper (random sampling + operator setup in plain JAX; the
# image-sized compute runs in the single Pallas kernel above).
# ----------------------------------------------------------------------------
class DegraderPallas:
    """Degrader(blur_opt=RandomBlur(iso=1, gaussian=1, sinc=0, generalized=0,
    ksize=21), deg_scale=1, crop_size=None).

    NOTE: the separable (outer-product) decomposition used by the Pallas kernel
    is only valid for this exact RandomBlur configuration."""

    def __init__(self, ksize=KSIZE, range_x=RANGE_X, range_radius=RANGE_RADIUS,
                 deg_scale=1, operand_dtype=jnp.float32):
        self.ksize = ksize
        self.range_x = range_x
        self.range_radius = range_radius
        self.deg_scale = deg_scale
        # bf16 operands recommended on v6e/v7x (MXU-native); f32 is the
        # reference-accurate default.
        self.operand_dtype = operand_dtype
        ax = jnp.arange(0, ksize, dtype=jnp.float32) - ksize // 2
        # torch.meshgrid(ax, ax) default 'ij' indexing
        self.xx = jnp.tile(ax[:, None], (1, ksize))   # xx[i, j] = ax[i]
        self.yy = jnp.tile(ax[None, :], (ksize, 1))   # yy[i, j] = ax[j]

    def __call__(self, x, key, src=None):
        src = x if src is None else src
        B, C, H, W = src.shape
        assert H > PAD and W > PAD, "reflect padding requires H, W > ksize // 2"

        # ---- RandomBlur.create_kernel (iso, gaussian, no sinc) ----
        k_sig, k_rad = jax.random.split(key)
        ratio_sigma = jax.random.uniform(k_sig, (B,), dtype=jnp.float32)
        sigma_x = ratio_sigma * (self.range_x[1] - self.range_x[0]) + self.range_x[0]
        sigma_y = sigma_x                               # iso_prob = 1
        theta = jnp.zeros((B,), jnp.float32)            # iso -> theta = 0
        beta = jnp.ones((B,), jnp.float32)              # generalized_prob = 0
        is_gauss = jnp.ones((B,), jnp.float32)          # gaussian_prob = 1
        radius = jax.random.randint(k_rad, (B,),
                                    self.range_radius[0],
                                    self.range_radius[1] + 1)
        is_sinc = jnp.zeros((B,), jnp.float32)          # sinc_prob = 0
        omega = jnp.zeros((B,), jnp.float32)
        # TODO(synk): sinc kernel path (scipy.special.j1) skipped; zero weight here.

        k2d = _make_blur_kernels(sigma_x, radius.astype(jnp.float32),
                                 self.xx, self.yy)        # (B, K, K), plain XLA

        # Separable 1-D taps of the normalized outer-product kernel.
        k1d_v = jnp.sum(k2d, axis=2)                      # taps along H (rows)
        k1d_h = jnp.sum(k2d, axis=1)                      # taps along W (cols)
        m_h = _reflect_band(k1d_v, H)                     # (B,H,H): out = m_h @ img
        a_wT = jnp.swapaxes(_reflect_band(k1d_h, W), 1, 2)  # (B,W,W): out = img @ a_wT

        # ---- fused reflect-pad + separable blur (MXU) + quantization ----
        lr_hcw = blur_quantize(x, m_h, a_wT, operand_dtype=self.operand_dtype)
        lr = lr_hcw.reshape(B, H, C, W).transpose(0, 2, 1, 3)   # back to (B,C,H,W)

        outs = OrderedDict()
        outs.update({
            "sigma_x": sigma_x, "sigma_y": sigma_y, "theta": theta,
            "beta": beta, "is_gauss": is_gauss,
            "radius": radius, "is_sinc": is_sinc, "omega": omega,
            "hr": src, "lr": lr,
        })
        aux = {"kernel": k2d, "m_h": m_h, "a_w": a_wT}
        return outs, aux


# ----------------------------------------------------------------------------
# main
# ----------------------------------------------------------------------------
if __name__ == "__main__":
    key = jax.random.PRNGKey(0)
    k_img, k_deg = jax.random.split(key)

    B, C, H, W = 2, 4, 16, 16
    x = jax.random.uniform(k_img, (B, C, H, W), dtype=jnp.float32)

    # --- reference-accurate (f32 operand) run ---
    degrader = DegraderPallas()
    outs, aux = degrader(x, k_deg)
    jax.block_until_ready(outs["lr"])

    # ---- float64 numpy reference (original 2-D reflect-pad conv formulation) ----
    ax = np.arange(KSIZE, dtype=np.float64) - KSIZE // 2
    xx = np.tile(ax[:, None], (1, KSIZE))
    yy = np.tile(ax[None, :], (KSIZE, 1))
    sigma = np.asarray(outs["sigma_x"], np.float64)
    radius = np.asarray(outs["radius"], np.float64)
    dist = (xx * xx + yy * yy)[None] / (2.0 * sigma[:, None, None] ** 2)
    ref_k = np.exp(-dist)
    mask = ((np.abs(xx)[None] - radius[:, None, None]) <= 0) & \
           ((np.abs(yy)[None] - radius[:, None, None]) <= 0)
    ref_k = ref_k * mask
    ref_k = ref_k / ref_k.sum(axis=(1, 2), keepdims=True)

    x64 = np.asarray(x, np.float64)
    x_pad = np.pad(x64, ((0, 0), (0, 0), (PAD, PAD), (PAD, PAD)), mode="reflect")
    ref_blur = np.zeros((B, C, H, W), np.float64)
    for u in range(KSIZE):
        for v in range(KSIZE):
            ref_blur += ref_k[:, u, v][:, None, None, None] * \
                x_pad[:, :, u:u + H, v:v + W]
    ref_lr = np.round(np.clip(ref_blur * 255.0, 0.0, 255.0)) / 255.0

    # 1) 2-D blur kernels match the original formulation.
    assert float(np.max(np.abs(np.asarray(aux["kernel"], np.float64) - ref_k))) < 1e-5

    # 2) Reflect-folded separable operators reproduce the 2-D conv exactly
    #    (applied in float64 so only operator construction is tested).
    m_h64 = np.asarray(aux["m_h"], np.float64)
    a_w64 = np.asarray(aux["a_w"], np.float64)
    t64 = np.einsum("bchw,bwj->bchj", x64, a_w64)
    sep64 = np.einsum("bis,bcsj->bcij", m_h64, t64)
    assert float(np.max(np.abs(sep64 - ref_blur))) < 1e-5

    # 3) Fused Pallas blur+quantize output: values land on the 1/255 grid and
    #    agree with the reference within quantization (+ MXU f32 slack).
    lr = np.asarray(outs["lr"], np.float64)
    assert float(np.max(np.abs(lr * 255.0 - np.round(lr * 255.0)))) < 1e-3
    assert float(np.max(np.abs(lr - ref_lr))) <= 2.0 / 255.0 + 1e-5
    assert outs["hr"].shape == (B, C, H, W) and outs["lr"].shape == (B, C, H, W)

    # --- bf16-operand run (v6e/v7x MXU-native mode): quantized agreement ---
    degrader_bf16 = DegraderPallas(operand_dtype=jnp.bfloat16)
    outs16, _ = degrader_bf16(x, k_deg)
    jax.block_until_ready(outs16["lr"])
    lr16 = np.asarray(outs16["lr"], np.float64)
    assert float(np.max(np.abs(lr16 * 255.0 - np.round(lr16 * 255.0)))) < 1e-3
    assert float(np.max(np.abs(lr16 - ref_lr))) <= 3.0 / 255.0 + 1e-4

    print("KERNEL_OK")
</pallas_src>

<mosaic_0001>
module attributes {stable_mosaic.version = 11 : i64} {
  func.func @body(%arg0: i32, %arg1: memref<1x64x16xf32, #tpu.memory_space<vmem>>, %arg2: memref<1x16x16xf32, #tpu.memory_space<vmem>>, %arg3: memref<1x16x16xf32, #tpu.memory_space<vmem>>, %arg4: memref<1x16x64xf32, #tpu.memory_space<vmem>>, %arg5: memref<16x64xf32, #tpu.memory_space<vmem>>) attributes {dimension_semantics = [#tpu.dimension_semantics<parallel>], iteration_bounds = array<i64: 2>, scalar_prefetch = 0 : i64, scratch_operands = 1 : i64, tpu.core_type = #tpu.core_type<tc>, window_params = [{transform_indices = @transform_0, window_bounds = array<i64: 1, 64, 16>}, {transform_indices = @transform_1, window_bounds = array<i64: 1, 16, 16>}, {transform_indices = @transform_2, window_bounds = array<i64: 1, 16, 16>}, {transform_indices = @transform_3, window_bounds = array<i64: 1, 16, 64>}]} {
    %c0 = arith.constant 0 : index
    %c0_0 = arith.constant 0 : index
    %c0_1 = arith.constant 0 : index
    %0 = vector.load %arg2[%c0, %c0_0, %c0_1] : memref<1x16x16xf32, #tpu.memory_space<vmem>>, vector<1x16x16xf32>
    %1 = vector.shape_cast %0 : vector<1x16x16xf32> to vector<16x16xf32>
    %c0_2 = arith.constant 0 : index
    %c0_3 = arith.constant 0 : index
    %c0_4 = arith.constant 0 : index
    %2 = vector.load %arg3[%c0_2, %c0_3, %c0_4] : memref<1x16x16xf32, #tpu.memory_space<vmem>>, vector<1x16x16xf32>
    %3 = vector.shape_cast %2 : vector<1x16x16xf32> to vector<16x16xf32>
    %c0_5 = arith.constant 0 : index
    %c0_6 = arith.constant 0 : index
    %c0_7 = arith.constant 0 : index
    %4 = vector.load %arg1[%c0_5, %c0_6, %c0_7] : memref<1x64x16xf32, #tpu.memory_space<vmem>>, vector<1x64x16xf32>
    %5 = vector.shape_cast %4 : vector<1x64x16xf32> to vector<64x16xf32>
    %cst = arith.constant dense<0.000000e+00> : vector<64x16xf32>
    %6 = tpu.matmul %5, %3, %cst {dimension_numbers = #tpu.dot_dimension_numbers<[1], [0], [0], [1], [0, 0, 1, 1], [], []>} : vector<64x16xf32>, vector<16x16xf32>, vector<64x16xf32> -> vector<64x16xf32>
    %7 = vector.extract_strided_slice %6 {offsets = [0, 0], sizes = [16, 16], strides = [1, 1]} : vector<64x16xf32> to vector<16x16xf32>
    %c0_8 = arith.constant 0 : index
    %c0_9 = arith.constant 0 : index
    %8 = vector.load %arg5[%c0_8, %c0_9] : memref<16x64xf32, #tpu.memory_space<vmem>>, vector<16x16xf32>
    tpu.vector_store %arg5[%c0_8, %c0_9], %7 {strides = array<i32>} : memref<16x64xf32, #tpu.memory_space<vmem>>, vector<16x16xf32>,
    %9 = vector.extract_strided_slice %6 {offsets = [16, 0], sizes = [16, 16], strides = [1, 1]} : vector<64x16xf32> to vector<16x16xf32>
    %c0_10 = arith.constant 0 : index
    %c16 = arith.constant 16 : index
    %10 = vector.load %arg5[%c0_10, %c16] : memref<16x64xf32, #tpu.memory_space<vmem>>, vector<16x16xf32>
    tpu.vector_store %arg5[%c0_10, %c16], %9 {strides = array<i32>} : memref<16x64xf32, #tpu.memory_space<vmem>>, vector<16x16xf32>,
    %11 = vector.extract_strided_slice %6 {offsets = [32, 0], sizes = [16, 16], strides = [1, 1]} : vector<64x16xf32> to vector<16x16xf32>
    %c0_11 = arith.constant 0 : index
    %c32 = arith.constant 32 : index
    %12 = vector.load %arg5[%c0_11, %c32] : memref<16x64xf32, #tpu.memory_space<vmem>>, vector<16x16xf32>
    tpu.vector_store %arg5[%c0_11, %c32], %11 {strides = array<i32>} : memref<16x64xf32, #tpu.memory_space<vmem>>, vector<16x16xf32>,
    %13 = vector.extract_strided_slice %6 {offsets = [48, 0], sizes = [16, 16], strides = [1, 1]} : vector<64x16xf32> to vector<16x16xf32>
    %c0_12 = arith.constant 0 : index
    %c48 = arith.constant 48 : index
    %14 = vector.load %arg5[%c0_12, %c48] : memref<16x64xf32, #tpu.memory_space<vmem>>, vector<16x16xf32>
    tpu.vector_store %arg5[%c0_12, %c48], %13 {strides = array<i32>} : memref<16x64xf32, #tpu.memory_space<vmem>>, vector<16x16xf32>,
    %c0_13 = arith.constant 0 : index
    %c0_14 = arith.constant 0 : index
    %15 = vector.load %arg5[%c0_13, %c0_14] : memref<16x64xf32, #tpu.memory_space<vmem>>, vector<16x64xf32>
    %cst_15 = arith.constant dense<0.000000e+00> : vector<16x64xf32>
    %16 = tpu.matmul %1, %15, %cst_15 {dimension_numbers = #tpu.dot_dimension_numbers<[1], [0], [0], [1], [0, 0, 1, 1], [], []>} : vector<16x16xf32>, vector<16x64xf32>, vector<16x64xf32> -> vector<16x64xf32>
    %cst_16 = arith.constant 2.550000e+02 : f32
    %17 = vector.broadcast %cst_16 : f32 to vector<16x64xf32>
    %18 = arith.mulf %16, %17 : vector<16x64xf32>
    %cst_17 = arith.constant 0.000000e+00 : f32
    %cst_18 = arith.constant 2.550000e+02 : f32
    %19 = vector.broadcast %cst_17 : f32 to vector<16x64xf32>
    %20 = arith.maximumf %19, %18 : vector<16x64xf32>
    %21 = vector.broadcast %cst_18 : f32 to vector<16x64xf32>
    %22 = arith.minimumf %21, %20 : vector<16x64xf32>
    %23 = math.roundeven %22 : vector<16x64xf32>
    %cst_19 = arith.constant 0.00392156886 : f32
    %24 = vector.broadcast %cst_19 : f32 to vector<16x64xf32>
    %25 = arith.mulf %23, %24 : vector<16x64xf32>
    %c0_20 = arith.constant 0 : index
    %c0_21 = arith.constant 0 : index
    %c0_22 = arith.constant 0 : index
    %26 = vector.load %arg4[%c0_20, %c0_21, %c0_22] : memref<1x16x64xf32, #tpu.memory_space<vmem>>, vector<1x16x64xf32>
    %27 = vector.shape_cast %26 : vector<1x16x64xf32> to vector<16x64xf32>
    %28 = vector.shape_cast %25 : vector<16x64xf32> to vector<1x16x64xf32>
    tpu.vector_store %arg4[%c0_20, %c0_21, %c0_22], %28 {strides = array<i32>} : memref<1x16x64xf32, #tpu.memory_space<vmem>>, vector<1x16x64xf32>,
    return
  }
  func.func @transform_0(%arg0: i32) -> (i32, i32, i32) {
    %c0_i32 = arith.constant 0 : i32
    %c0_i32_0 = arith.constant 0 : i32
    %c0_i32_1 = arith.constant 0 : i32
    return %arg0, %c0_i32, %c0_i32_0 : i32, i32, i32
  }
  func.func @transform_1(%arg0: i32) -> (i32, i32, i32) {
    %c0_i32 = arith.constant 0 : i32
    %c0_i32_0 = arith.constant 0 : i32
    %c0_i32_1 = arith.constant 0 : i32
    return %arg0, %c0_i32, %c0_i32_0 : i32, i32, i32
  }
  func.func @transform_2(%arg0: i32) -> (i32, i32, i32) {
    %c0_i32 = arith.constant 0 : i32
    %c0_i32_0 = arith.constant 0 : i32
    %c0_i32_1 = arith.constant 0 : i32
    return %arg0, %c0_i32, %c0_i32_0 : i32, i32, i32
  }
  func.func @transform_3(%arg0: i32) -> (i32, i32, i32) {
    %c0_i32 = arith.constant 0 : i32
    %c0_i32_0 = arith.constant 0 : i32
    %c0_i32_1 = arith.constant 0 : i32
    return %arg0, %c0_i32, %c0_i32_0 : i32, i32, i32
  }
}

</mosaic_0001>

<bundles_post_ra>
// kernel: tpu_custom_call.1
= control target key start
LH: loop header
LB: loop body
LE: loop exit
PB: predicated region body
PF: predicated region fallthrough
CT: control target
= control target key end

     0   :  { %8 = vsyncpa [#allocation4], 0  ;;  %s768_s0 = inlined_call_operand.vmem [shape: f32[2,64,16], index: 0, kind: input, shape index: {}]   ;;  %s769_s1 = inlined_call_operand.vmem [shape: f32[2,16,16], index: 1, kind: input, shape index: {}]   ;;  %s770_s2 = inlined_call_operand.vmem [shape: f32[2,16,16], index: 2, kind: input, shape index: {}]   ;;  %s771_s3 = inlined_call_operand.hbm [shape: f32[2,16,64], index: 3, kind: output, shape index: {}]  }
   0x1   :  { %10 = vsyncpa [#allocation4 + $0x1], 0  ;;  %s651_s12 = smov 0   ;;  %s653_s13 = smov 0  }
   0x2   :  { %s655_s14 = smov 0   ;;  %s657_s15 = smov 0  }
   0x3 LB: > { %s672_s16 = sadd.s32 4294967295, %s624_s15   ;;  %s468_s17 = sadd.s32 4294967294, %s624_s15   ;;  %s624_s15 = sphi %s657_s15, %s777_s15   ;;  %s620_s14 = sphi %s655_s14, %s776_s14   ;;  %s616_s13 = sphi %s653_s13, %s775_s13   ;;  %s612_s12 = sphi %s651_s12, %s774_s12  }
   0x4   : > { %s676_s18 = sadd.s32 1, %s624_s15   ;;  %s101_s19 = sadd.s32 1, %s620_s14 }
   0x5   : > { %s98_s20 = ssub.s32 %s624_s15, %s676_s18  ;;  %p111_p0 = scmp.ne.s32.totalorder %s620_s14, %s616_s13 }
   0x6   : > { %p99_p1 = scmp.eq.s32.totalorder %s98_s20, 0  ;;  %p112_p2 = scmp.eq.s32.totalorder %s672_s16, 1 }
   0x7   : > { %p117_p3 = scmp.ne.s32.totalorder %s616_s13, %s612_s12  ;;  %p118_p4 = scmp.eq.s32.totalorder %s468_s17, 1 }
   0x8   : > { %s687_s21 = scalar_select %p99_p1, %s620_s14, %s101_s19  }
   0x9   : > { %p689_p5 = por %p112_p2, %p111_p0  ;;  %p693_p6 = por %p118_p4, %p117_p3 }
   0xa   : > { %p471_p7 = scmp.ge.s32.totalorder %s624_s15, 1  ;;  %p160_p8 = scmp.lt.s32.totalorder %s624_s15, 3 }
   0xc   : > { %p161_p9 = pnand %p471_p7, %p160_p8 }
   0xd   : > { %p194_p10 = scmp.lt.s32.totalorder (!%p161_p9), %s672_s16, 1  ;;  %s626_s6 = smov (!%p161_p9), 16  }
   0xe   : > { %164 = sbr.rel (%p161_p9) target bundleno = 458 (0x1ca), region = 32  ;;  %s627_s7 = smov (!%p161_p9), 32  }
   0xf   : > { %s628_s8 = smov (!%p161_p9), 48   ;;  %s191_s17 = sand.u32 (!%p161_p9), 1, %s616_s13  }
  0x10   : > { %s472_s19 = sshll.u32 (!%p161_p9), %s191_s17, 4  ;;  %s497_s20 = sshll.u32 (!%p161_p9), %s672_s16, 4 }
  0x11   : > { %s193_s27 = scalar_lea.vmem (!%p161_p9), [#allocation3], %s472_s19 }
  0x12   : > { %s379_s28 = sshll.u32 (!%p161_p9), %s193_s27, 4  ;;  %s380_s28 = int_to_ptr.vmem [resolvable:$true] %s379_s28 }
  0x13   : > { %s701_s24 = scalar_select %p194_p10, %s672_s16, 1  ;;  %vm221_vm0 = vcmask 130048   ;;  %vm297_vm1 = vcmask 261248   ;;  %vm308_vm2 = vcmask 392448   ;;  %vm319_vm3 = vcmask 523648  }
  0x14   : > { %vm363_vm5 = vcmask 523264   ;;  %s367_s16 = scalar_lea.sflag [#allocation4], %s191_s17 }
  0x15   : > { %s494_s25 = sshll.u32 %s701_s24, 6  ;;  %s495_s26 = sshll.u32 %s701_s24, 4 }
  0x16   : > { %s198_s29 = scalar_lea.vmem %s768_s0, %s494_s25  ;;  %s208_s5 = scalar_lea.vmem %s770_s2, %s495_s26 }
  0x17   : > { %v212_v0 = vld [vmem:[%s208_s5 + $0x8] sm:$0xff]  ;;  %v211_v1 = vld [vmem:[%s208_s5] sm:$0xff]  ;;  %v216_v3 = vld [vmem:[%s198_s29 + $0x18] sm:$0xff]  ;;  %s203_s11 = scalar_lea.vmem %s769_s1, %s495_s26  ;;  %s378_s26 = scalar_lea.hbm %s771_s3, %s497_s20 }
  0x18   : > { %260 = vmatpush.msra.mxu0 %v212_v0  ;;  %498 = vmatpush.msra.mxu2 %v212_v0  ;;  %v213_v2 = vld [vmem:[%s198_s29] sm:$0xff]  ;;  %v219_v4 = vld [vmem:[%s198_s29 + $0x30] sm:$0xff]  ;;  %v214_v5 = vld [vmem:[%s198_s29 + $0x8] sm:$0xff] }
  0x19   : > { %499 = vmatpush.msra.mxu3 %v212_v0  ;;  %v217_v6 = vld [vmem:[%s198_s29 + $0x20] sm:$0xff]  ;;  %v220_v7 = vld [vmem:[%s198_s29 + $0x38] sm:$0xff]  ;;  %v215_v8 = vld [vmem:[%s198_s29 + $0x10] sm:$0xff] }
  0x1a   : > { %261 = vmatpush.msra.mxu0 %v211_v1  ;;  %500 = vmatpush.msra.mxu2 %v211_v1  ;;  %v218_v9 = vld [vmem:[%s198_s29 + $0x28] sm:$0xff]  ;;  %v209_v25 = vld [vmem:[%s203_s11] sm:$0xff]  ;;  %s381_s29 = sshll.u32 %s378_s26, 4  ;;  %s382_s29 = int_to_ptr.hbm [resolvable:$true] %s381_s29 }
  0x1b   : > { %479 = vmatmul.msk.f32.vlgmr.msra.gmra.mxu0 %vm221_vm0, %v213_v2  ;;  %482 = vmatmul.msk.f32.vlgmr.msra.gmra.mxu2 %vm221_vm0, %v216_v3  ;;  %v210_v27 = vld [vmem:[%s203_s11 + $0x8] sm:$0xff]  ;;  %s576_s30 = sshra.s32 %s382_s29, 4  ;;  %s577_s30 = int_to_ptr.hbm [resolvable:$true] %s576_s30 }
  0x1c   : > { %501 = vmatpush.msra.mxu3 %v211_v1  ;;  %s578_s4 = scalar_lea.hbm %s577_s30, 16  ;;  %p583_p0 = scmp.lt.s32.totalorder %s577_s30, %s771_s3 }
  0x1d   : > { %485 = vmatmul.msk.f32.vlgmr.msra.gmra.mxu3 %vm221_vm0, %v219_v4  ;;  %p579_p11 = scmp.ne.s32.totalorder %s577_s30, %s578_s4 }
  0x1f   : > { %p580_p12 = pnand %p579_p11, %p689_p5 }
  0x21   : > { %p581_p13 = pneg %p580_p12 }
  0x23   : > { %480 = vmatmul.msk.f32.gmra.mxu0 %vm221_vm0, %v214_v5  ;;  %483 = vmatmul.msk.f32.gmra.mxu2 %vm221_vm0, %v217_v6 }
  0x25   : > { %486 = vmatmul.msk.f32.gmra.mxu3 %vm221_vm0, %v220_v7 }
  0x2b   : > { %481 = vmatmul.msk.f32.gmra.mxu0 %vm221_vm0, %v215_v8  ;;  %484 = vmatmul.msk.f32.gmra.mxu2 %vm221_vm0, %v218_v9 }
  0x98   : > { %v263_v10 = vpop.f32.mrf.mxu0 }
  0x99   : > { %287 = vst.msk [vmem:[#allocation2] sm:$0xff] %vm221_vm0, %v263_v10 }
  0x9e   : > { %v272_v11 = vpop.f32.mrf.mxu2 }
  0x9f   : > { %293 = vrot.lane.b32.xlu0 %v272_v11, %s626_s6 }
  0xa0   : > { %v266_v12 = vpop.f32.mrf.mxu0  ;;  %v281_v13 = vpop.f32.mrf.mxu3 }
  0xa1   : > { %288 = vst.msk [vmem:[#allocation2 + $0x8] sm:$0xff] %vm221_vm0, %v266_v12 }
  0xa6   : > { %v275_v14 = vpop.f32.mrf.mxu2 }
  0xa7   : > { %302 = vrot.lane.b32.xlu2 %v275_v14, %s627_s7 }
  0xa8   : > { %v269_v15 = vpop.f32.mrf.mxu0  ;;  %v284_v17 = vpop.f32.mrf.mxu3 }
  0xa9   : > { %291 = vrot.lane.b32.xlu1 %v269_v15, %s626_s6 }
  0xae   : > { %v278_v16 = vpop.f32.mrf.mxu2 }
  0xaf   : > { %313 = vrot.lane.b32.xlu2 %v281_v13, %s628_s8  ;;  %304 = vrot.lane.b32.xlu0 %v278_v16, %s627_s7  ;;  %s582_s7 = scalar_lea.hbm %s771_s3, 32 }
  0xb0   : > { %p584_p1 = scmp.lt.s32.totalorder %s582_s7, %s578_s4 }
  0xb1   : > { %315 = vrot.lane.b32.xlu1 %v284_v17, %s628_s8 }
  0xb2   : > { %p585_p2 = por %p584_p1, %p583_p0 }
  0xb4   : > { %p586_p3 = pnand %p585_p2, %p581_p13 }
 0x101   : > { %v303_v19 = vpop.permute.xlu2 %302 }
 0x109   : > { %v314_v21 = vpop.permute.xlu2 %313 }
 0x111   : > { %v294_v18 = vpop.permute.xlu0 %293 }
 0x112   : > { %299 = vst.msk [vmem:[#allocation2 + $0x8] sm:$0xff] %vm297_vm1, %v294_v18 }
 0x11b   : > { %v292_v20 = vpop.permute.xlu1 %291 }
 0x11c   : > { %298 = vst.msk [vmem:[#allocation2] sm:$0xff] %vm297_vm1, %v292_v20 }
 0x11d   : > { %309 = vst.msk [vmem:[#allocation2] sm:$0xff] %vm308_vm2, %v303_v19 }
 0x11e   : > { %320 = vst.msk [vmem:[#allocation2] sm:$0xff] %vm319_vm3, %v314_v21 }
 0x121   : > { %v305_v22 = vpop.permute.xlu0 %304 }
 0x122   : > { %310 = vst.msk [vmem:[#allocation2 + $0x8] sm:$0xff] %vm308_vm2, %v305_v22 }
 0x123   : > { %v316_v23 = vpop.permute.xlu1 %315 }
 0x124   : > { %321 = vst.msk [vmem:[#allocation2 + $0x8] sm:$0xff] %vm319_vm3, %v316_v23 }
 0x125   : > { %v322_v26 = vld [vmem:[#allocation2] sm:$0xff] }
 0x12b   : > { %v323_v24 = vld [vmem:[#allocation2 + $0x8] sm:$0xff] }
 0x12c   : > { %344 = vmatpush.msra.mxu1 %v323_v24 }
 0x12e   : > { %345 = vmatpush.msra.mxu1 %v322_v26 }
 0x12f   : > { %487 = vmatmul.msk.f32.vlgmr.msra.gmra.mxu1 %vm221_vm0, %v209_v25 }
 0x137   : > { %488 = vmatmul.msk.f32.gmra.mxu1 %vm221_vm0, %v210_v27 }
 0x1ac   : > { %v347_v28 = vpop.f32.mrf.mxu1 }
 0x1ad   : > { %v353_v29 = vmul.f32 255.0, %v347_v28 }
 0x1af   : > { %v355_v30 = vmax.f32 %v353_v29, 0.0 }
 0x1b1   : > { %v357_v31 = vmin.f32 %v355_v30, 255.0 }
 0x1b3   : > { %v504_v32 = vcvt.f32.s32 %v357_v31  ;;  %v502_v36 = vand.u32 2147483647, %v357_v31  ;;  %v507_v38 = vand.u32 2147483648, %v357_v31 }
 0x1b4   : > { %v350_v33 = vpop.f32.mrf.mxu1 }
 0x1b5   : > { %v505_v34 = vcvt.s32.f32 %v504_v32  ;;  %v354_v35 = vmul.f32 255.0, %v350_v33  ;;  %vm503_vm4 = vcmp.lt.f32.partialorder %v502_v36, 8388608.0 }
 0x1b7   : > { %v506_v37 = vand.u32 2147483647, %v505_v34  ;;  %v356_v39 = vmax.f32 %v354_v35, 0.0 }
 0x1b9   : > { %v508_v40 = vor.u32 %v507_v38, %v506_v37  ;;  %v358_v41 = vmin.f32 %v356_v39, 255.0 }
 0x1bb   : > { %v509_v42 = vsel %vm503_vm4, %v508_v40, %v357_v31  ;;  %v512_v43 = vcvt.f32.s32 %v358_v41  ;;  %v510_v46 = vand.u32 2147483647, %v358_v41  ;;  %v515_v48 = vand.u32 2147483648, %v358_v41 }
 0x1bc   : > { %v361_v44 = vmul.f32 0.003921569, %v509_v42 }
 0x1bd   : > { %v513_v45 = vcvt.s32.f32 %v512_v43  ;;  %vm511_vm6 = vcmp.lt.f32.partialorder %v510_v46, 8388608.0 }
 0x1be   : > { %364 = vst.msk [vmem:[%s193_s27] sm:$0xff] %vm363_vm5, %v361_v44 }
 0x1bf   : > { %v514_v47 = vand.u32 2147483647, %v513_v45 }
 0x1c1   : > { %v516_v49 = vor.u32 %v515_v48, %v514_v47 }
 0x1c3   : > { %v517_v50 = vsel %vm511_vm6, %v516_v49, %v358_v41 }
 0x1c4   : > { %v362_v51 = vmul.f32 0.003921569, %v517_v50 }
 0x1c6   : > { %365 = vst.msk [vmem:[%s193_s27 + $0x8] sm:$0xff] %vm363_vm5, %v362_v51 }
 0x1c7   : > { %589 = shalt.err (!%p586_p3)
}
 0x1c8   : > { %s629_s10 = smov 128   ;;  %s630_s11 = smov 8  }
 0x1c9   : > { %518 = dma.vmem_to_hbm [thread:$0]  (%p689_p5), %s380_s28, 256, %s382_s29, %s367_s16, %s629_s10, %s629_s10, %s630_s11  }
 0x1ca PF: > { %p524_p4 = scmp.ge.s32.totalorder %s624_s15, 2  ;;  %s396_s17 = sand.u32 1, %s612_s12  }
 0x1cb   : > { %s397_s19 = scalar_lea.sflag [#allocation4], %s396_s17 }
 0x1cc   : > { %p521_p7 = pnand %p524_p4, %p693_p6 }
 0x1ce   : > { %p522_p8 = pneg %p521_p7 }
 0x1d0   : > { %607 = dma.done.wait (%p522_p8), %s397_s19, 256  }
 0x1d1   : > { %609 = vsyncadd (%p522_p8), %s397_s19, 4294967040  ;;  %p13_p9 = scmp.ge.s32.totalorder %s676_s18, 4   ;;  %s774_s12 = smov %s616_s13 }
 0x1d2   : > { %s775_s13 = smov %s620_s14  ;;  %s776_s14 = smov %s687_s21 }
 0x1d3   : > { %s777_s15 = smov %s676_s18  ;;  %15 = sbr.rel (!%p13_p9) target bundleno = 3 (0x3), region = 73 }
 0x1d8   :  { %403 = vsyncpa [#allocation4], 1 }
 0x1d9   :  { %405 = vsyncpa [#allocation4 + $0x1], 1 }

</bundles_post_ra>
